<compile_context>
chip_gen: v6e
topology: v6e:2x2x1
jax: 0.10.0
libtpu: 0.0.40
codegen_flags: <defaults>
</compile_context>

<pallas_src>
import jax
import jax.numpy as jnp
from jax.experimental import pallas as pl
from jax.experimental.pallas import tpu as pltpu

_TARGET_BLOCK_BYTES = 4 << 20      # ~4 MiB per block (per perf review)
_MIN_COPY_BYTES = 1 << 20          # below this, skip the kernel entirely
_VMEM_LIMIT_BYTES = 32 << 20       # explicit scoped-VMEM budget (safe on all chips)
_ROW_ALIGN = 32                    # multiple-of-32 rows covers f32/bf16/int8 packing


def _copy_kernel(x_ref, o_ref):
    # Bit-exact pass-through copy of the current tile.
    o_ref[...] = x_ref[...]


def _copy_2d(x2d: jax.Array) -> jax.Array:
    """Tiled, lane-dense Pallas copy of a 2-D (rows, lanes) array."""
    rows, lanes = x2d.shape
    itemsize = jnp.dtype(x2d.dtype).itemsize

    # Byte-budgeted block rows, rounded down to a multiple of 32.
    budget_rows = max(_ROW_ALIGN,
                      (_TARGET_BLOCK_BYTES // (lanes * itemsize)) // _ROW_ALIGN * _ROW_ALIGN)

    if rows <= budget_rows:
        # Single block covering the full array (full-extent dims are always
        # legal w.r.t. the (8,128) tiling constraint).
        block_rows = rows
    else:
        # Guarantee >= 2 grid steps so v7x can shard the parallel axis across
        # both TensorCores; never exceed the byte budget.
        half = max(_ROW_ALIGN, (rows // 2) // _ROW_ALIGN * _ROW_ALIGN)
        block_rows = min(budget_rows, half)

    grid = (pl.cdiv(rows, block_rows),)

    return pl.pallas_call(
        _copy_kernel,
        out_shape=jax.ShapeDtypeStruct((rows, lanes), x2d.dtype),
        grid=grid,
        in_specs=[pl.BlockSpec((block_rows, lanes), lambda i: (i, 0))],
        out_specs=pl.BlockSpec((block_rows, lanes), lambda i: (i, 0)),
        compiler_params=pltpu.CompilerParams(
            # Independent row tiles -> shard across v7x's 2 TensorCores.
            dimension_semantics=("parallel",),
            vmem_limit_bytes=_VMEM_LIMIT_BYTES,
        ),
        cost_estimate=pl.CostEstimate(
            flops=0, transcendentals=0, bytes_accessed=2 * x2d.size * itemsize),
    )(x2d)


def _tiled_copy(x: jax.Array) -> jax.Array:
    """Bit-exact copy of `x` via the tiled, lane-dense Pallas kernel."""
    if x.size == 0:
        return x

    n = x.size
    orig_shape = x.shape

    # Widest lane-dense last dim that divides the element count.
    if n % 512 == 0:
        lanes = 512
    elif n % 128 == 0:
        lanes = 128
    else:
        # Non-128-divisible: pad the flat view to a multiple of 128, run the
        # same tiled copy, then slice back (replaces the old grid=() fallback).
        lanes = 128
        pad = lanes - (n % lanes)
        flat = jnp.pad(x.reshape(-1), (0, pad))
        out = _copy_2d(flat.reshape(-1, lanes))
        return out.reshape(-1)[:n].reshape(orig_shape)

    return _copy_2d(x.reshape(-1, lanes)).reshape(orig_shape)


def _clone(x: jax.Array) -> jax.Array:
    """torch .clone() equivalent.

    JAX arrays are immutable, so returning the input directly is bit-identical
    to a clone.  Only large tensors go through the explicit Pallas copy (to
    demonstrate / provide a distinct HBM buffer); tiny tensors skip the kernel
    launch entirely per the performance review.
    """
    if x.size == 0 or x.nbytes < _MIN_COPY_BYTES:
        return x
    return _tiled_copy(x)


def identity_highway(x_with_fastpass: jax.Array,
                     predictions_placeholder: jax.Array):
    """Pallas equivalent of IdentityHighway.forward."""
    return _clone(x_with_fastpass), _clone(predictions_placeholder)


if __name__ == "__main__":
    key = jax.random.PRNGKey(0)
    kx, kp = jax.random.split(key)

    # Small shapes consistent with an early-exit ViT highway:
    #   x_with_fastpass: (batch=2, seq=8, hidden=32)
    #   predictions_placeholder: (batch=2, num_classes=16)
    x = jax.random.normal(kx, (2, 8, 32), dtype=jnp.float32)
    preds = jax.random.normal(kp, (2, 16), dtype=jnp.float32)

    # Module-level wrapper (tiny inputs take the zero-cost pass-through path).
    x_out, preds_out = identity_highway(x, preds)
    jax.block_until_ready((x_out, preds_out))
    assert x_out.shape == x.shape and x_out.dtype == x.dtype
    assert preds_out.shape == preds.shape and preds_out.dtype == preds.dtype
    assert jnp.array_equal(x_out, x)
    assert jnp.array_equal(preds_out, preds)

    # Explicitly exercise both Pallas copy code paths on the same small
    # tensors (512 elems -> lane-divisible tiled path; 32 elems -> padded
    # remainder path) to verify the kernel compiles and runs on TPU.
    x_copy = _tiled_copy(x)
    preds_copy = _tiled_copy(preds)
    jax.block_until_ready((x_copy, preds_copy))
    assert jnp.array_equal(x_copy, x)
    assert jnp.array_equal(preds_copy, preds)

    print("KERNEL_OK")
</pallas_src>

<mosaic_0001>
module attributes {stable_mosaic.version = 11 : i64} {
  func.func @_copy_kernel(%arg0: i32, %arg1: memref<1x512xf32, #tpu.memory_space<vmem>>, %arg2: memref<1x512xf32, #tpu.memory_space<vmem>>) attributes {dimension_semantics = [#tpu.dimension_semantics<parallel>], iteration_bounds = array<i64: 1>, scalar_prefetch = 0 : i64, scratch_operands = 0 : i64, tpu.core_type = #tpu.core_type<tc>, window_params = [{transform_indices = @transform_0, window_bounds = array<i64: 1, 512>}, {transform_indices = @transform_1, window_bounds = array<i64: 1, 512>}]} {
    %c0 = arith.constant 0 : index
    %c0_0 = arith.constant 0 : index
    %0 = vector.load %arg1[%c0, %c0_0] : memref<1x512xf32, #tpu.memory_space<vmem>>, vector<1x512xf32>
    %c0_1 = arith.constant 0 : index
    %c0_2 = arith.constant 0 : index
    %1 = vector.load %arg2[%c0_1, %c0_2] : memref<1x512xf32, #tpu.memory_space<vmem>>, vector<1x512xf32>
    tpu.vector_store %arg2[%c0_1, %c0_2], %0 {strides = array<i32>} : memref<1x512xf32, #tpu.memory_space<vmem>>, vector<1x512xf32>,
    return
  }
  func.func @transform_0(%arg0: i32) -> (i32, i32) {
    %c0_i32 = arith.constant 0 : i32
    %c0_i32_0 = arith.constant 0 : i32
    return %arg0, %c0_i32 : i32, i32
  }
  func.func @transform_1(%arg0: i32) -> (i32, i32) {
    %c0_i32 = arith.constant 0 : i32
    %c0_i32_0 = arith.constant 0 : i32
    return %arg0, %c0_i32 : i32, i32
  }
}

</mosaic_0001>

<bundles_post_ra>
// kernel: tpu_custom_call.1
= control target key start
LH: loop header
LB: loop body
LE: loop exit
PB: predicated region body
PF: predicated region fallthrough
CT: control target
= control target key end

     0   :  { %6 = vsyncpa [#allocation3], 0  ;;  %s106_s0 = inlined_call_operand.hbm [shape: f32[1,512], index: 0, kind: input, shape index: {}]   ;;  %s107_s1 = inlined_call_operand.hbm [shape: f32[1,512], index: 1, kind: output, shape index: {}]  }
   0x1   :  { %7 = vsyncpa [#allocation4], 0  ;;  %s88_s6 = smov [#allocation2]  }
   0x2   :  { %s14_s7 = sshll.u32 %s88_s6, 4  ;;  %s15_s7 = int_to_ptr.vmem [resolvable:$true] %s14_s7 }
   0x3   :  { %s52_s8 = scalar_lea.vmem %s15_s7, 64  ;;  %p57_p1 = scmp.lt.s32.totalorder %s15_s7, %s15_s7 }
   0x4   :  { %p53_p0 = scmp.ne.s32.totalorder %s15_s7, %s52_s8  ;;  %p58_p2 = scmp.lt.s32.totalorder %s52_s8, %s52_s8 }
   0x6   :  { %p59_p3 = por %p58_p2, %p57_p1 }
   0x8   :  { %p60_p4 = pnand %p59_p3, %p53_p0 }
   0xa   :  { %63 = shalt.err (!%p60_p4)
}
   0xb   :  { %17 = dma.hbm_to_vmem [thread:$0]  %s106_s0, 64, %s15_s7, [#allocation3]  }
   0xc   :  { %84 = dma.done.wait [#allocation3], 64  }
   0xd   :  { %85 = vsyncadd [#allocation3], 4294967232  ;;  %v22_v0 = vlaneseq  ;;  %s89_s11 = smov [#allocation5]   ;;  %v21_v1 = vld [vmem:[#allocation2] sm:$0xf] }
   0xe   :  { %s33_s12 = sshll.u32 %s89_s11, 4  ;;  %s34_s12 = int_to_ptr.vmem [resolvable:$true] %s33_s12 }
   0xf   :  { %vm24_vm0 = vcmp.lt.s32.totalorder %v22_v0, 512  ;;  %s64_s13 = scalar_lea.vmem %s34_s12, 64  ;;  %p69_p6 = scmp.lt.s32.totalorder %s34_s12, %s34_s12 }
  0x10   :  { %26 = vst.msk [vmem:[#allocation5] sm:$0xf] %vm24_vm0, %v21_v1  ;;  %p65_p5 = scmp.ne.s32.totalorder %s34_s12, %s64_s13  ;;  %p70_p7 = scmp.lt.s32.totalorder %s64_s13, %s64_s13 }
  0x12   :  { %p71_p8 = por %p70_p7, %p69_p6 }
  0x14   :  { %p72_p9 = pnand %p71_p8, %p65_p5 }
  0x16   :  { %75 = shalt.err (!%p72_p9)
}
  0x17   :  { %36 = dma.vmem_to_hbm [thread:$0]  %s34_s12, 64, %s107_s1, [#allocation4]  }
  0x18   :  { %86 = dma.done.wait [#allocation4], 64  }
  0x19   :  { %87 = vsyncadd [#allocation4], 4294967232 }
  0x1a   :  { %40 = vsyncpa [#allocation3], 1 }
  0x1b   :  { %41 = vsyncpa [#allocation4], 1 }

</bundles_post_ra>
